<compile_context>
chip_gen: v5e
topology: v5e:2x2
jax: 0.10.0
libtpu: 0.0.40
codegen_flags: <defaults>
</compile_context>

<pallas_src>
import functools

import jax
import jax.numpy as jnp
from jax import lax
from jax.experimental import pallas as pl
from jax.experimental.pallas import tpu as pltpu


def _focal_loss_kernel(x_ref, t_ref, o_ref, *, alpha, gamma):
    """(TN, C) logits tile + (TN, 1) int32 targets tile -> (TN, 1) f32 losses."""
    x = x_ref[...].astype(jnp.float32)                 # (TN, C) widen in-register
    t = t_ref[...]                                     # (TN, 1) int32
    C = x.shape[-1]

    # Numerically-stable logsumexp along the class (lane) axis.
    m = jnp.max(x, axis=-1, keepdims=True)             # (TN, 1)
    z = x - m                                          # (TN, C)
    lse = jnp.log(jnp.sum(jnp.exp(z), axis=-1, keepdims=True))   # (TN, 1)

    # Target logit via one-hot select (no full log-prob tile materialized).
    cls_ids = lax.broadcasted_iota(jnp.int32, (1, C), 1)          # (1, C)
    onehot = cls_ids == t                                         # (TN, C) bool
    z_t = jnp.sum(jnp.where(onehot, z, 0.0), axis=-1, keepdims=True)  # (TN, 1)

    logpt = jnp.minimum(z_t - lse, 0.0)                # clamp guards pt > 1 roundoff
    pt = jnp.exp(logpt)                                # (TN, 1)

    one_m_pt = 1.0 - pt
    g = float(gamma)
    if g == 2.0:
        focal = one_m_pt * one_m_pt                    # avoid pow on the EUP
    elif g.is_integer():
        focal = lax.integer_pow(one_m_pt, int(g))
    else:
        focal = one_m_pt ** g

    # per-example focal loss: -alpha * (1 - p_t)^gamma * log p_t
    o_ref[...] = (-alpha) * focal * logpt              # (TN, 1) f32


def focal_loss(inputs, targets, *, alpha=1.0, gamma=2.0, reduction="mean",
               block_n=None):
    """inputs: (N, C) logits; targets: (N,) int class labels. FocalLoss.forward."""
    N, C = inputs.shape
    itemsize = jnp.dtype(inputs.dtype).itemsize
    sub = {4: 8, 2: 16, 1: 32}.get(itemsize, 8)        # min sublane multiple / dtype

    if block_n is None:
        # ~2 MiB of logits per tile (x2 for double-buffering) - safe on every
        # generation including v7x's 64 MiB VMEM; capped at 2048 rows.
        block_n = max(sub, min(2048, (2 * 1024 * 1024) // max(1, C * itemsize)))
    # Never tile larger than (rounded-up) N; keep a sublane-aligned row count.
    block_n = max(sub, min(block_n, -(-N // sub) * sub))
    block_n = (block_n // sub) * sub

    n_tiles = pl.cdiv(N, block_n)
    n_pad = n_tiles * block_n

    t_i32 = targets.astype(jnp.int32)
    if n_pad != N:                                     # ragged tail: pad, slice later
        inputs = jnp.pad(inputs, ((0, n_pad - N), (0, 0)))
        t_i32 = jnp.pad(t_i32, ((0, n_pad - N),))
    t2d = t_i32.reshape(n_pad, 1)

    kernel = functools.partial(
        _focal_loss_kernel, alpha=float(alpha), gamma=float(gamma)
    )

    per_row = pl.pallas_call(
        kernel,
        out_shape=jax.ShapeDtypeStruct((n_pad, 1), jnp.float32),
        grid_spec=pltpu.PrefetchScalarGridSpec(
            num_scalar_prefetch=0,
            grid=(n_tiles,),
            in_specs=[
                pl.BlockSpec((block_n, C), lambda i: (i, 0)),   # logits tile
                pl.BlockSpec((block_n, 1), lambda i: (i, 0)),   # targets tile
            ],
            out_specs=pl.BlockSpec((block_n, 1), lambda i: (i, 0)),
        ),
        compiler_params=pltpu.CompilerParams(
            # Independent output block per step -> shardable across 2 TCs (v7x).
            dimension_semantics=("parallel",),
        ),
    )(inputs, t2d)

    per_row = per_row[:N, 0]
    if reduction == "mean":
        return jnp.mean(per_row)
    elif reduction == "sum":
        return jnp.sum(per_row)
    return per_row


def _focal_loss_ref(inputs, targets, alpha=1.0, gamma=2.0):
    logp = jax.nn.log_softmax(inputs.astype(jnp.float32), axis=-1)
    logpt = jnp.take_along_axis(
        logp, targets[:, None].astype(jnp.int32), axis=-1)[:, 0]
    pt = jnp.exp(logpt)
    return jnp.mean(-alpha * (1.0 - pt) ** gamma * logpt)


if __name__ == "__main__":
    key = jax.random.PRNGKey(0)
    kx, kt = jax.random.split(key)
    N, C = 100, 32                              # N not a multiple of 8 on purpose
    logits = jax.random.normal(kx, (N, C), dtype=jnp.float32)
    targets = jax.random.randint(kt, (N,), 0, C, dtype=jnp.int32)

    ref = _focal_loss_ref(logits, targets, alpha=1.0, gamma=2.0)

    # Default (single large tile) path.
    loss = focal_loss(logits, targets, alpha=1.0, gamma=2.0)
    jax.block_until_ready(loss)
    assert jnp.allclose(loss, ref, atol=1e-5, rtol=1e-5), (loss, ref)

    # Multi-tile + padded-tail path.
    loss2 = focal_loss(logits, targets, alpha=1.0, gamma=2.0, block_n=32)
    jax.block_until_ready(loss2)
    assert jnp.allclose(loss2, ref, atol=1e-5, rtol=1e-5), (loss2, ref)

    print("KERNEL_OK")
</pallas_src>

<mosaic_0001>
module attributes {stable_mosaic.version = 11 : i64} {
  func.func @_focal_loss_kernel(%arg0: i32, %arg1: memref<104x32xf32, #tpu.memory_space<vmem>>, %arg2: memref<104x1xi32, #tpu.memory_space<vmem>>, %arg3: memref<104x1xf32, #tpu.memory_space<vmem>>) attributes {dimension_semantics = [#tpu.dimension_semantics<parallel>], iteration_bounds = array<i64: 1>, scalar_prefetch = 0 : i64, scratch_operands = 0 : i64, tpu.core_type = #tpu.core_type<tc>, window_params = [{transform_indices = @transform_0, window_bounds = array<i64: 104, 32>}, {transform_indices = @transform_1, window_bounds = array<i64: 104, 1>}, {transform_indices = @transform_2, window_bounds = array<i64: 104, 1>}]} {
    %c0 = arith.constant 0 : index
    %c0_0 = arith.constant 0 : index
    %0 = vector.load %arg1[%c0, %c0_0] : memref<104x32xf32, #tpu.memory_space<vmem>>, vector<104x32xf32>
    %c0_1 = arith.constant 0 : index
    %c0_2 = arith.constant 0 : index
    %1 = vector.load %arg2[%c0_1, %c0_2] : memref<104x1xi32, #tpu.memory_space<vmem>>, vector<104x1xi32>
    %cst = arith.constant dense<0xFF800000> : vector<104xf32>
    %2 = vector.multi_reduction <maximumf>, %0, %cst [1] : vector<104x32xf32> to vector<104xf32>
    %3 = vector.shape_cast %2 : vector<104xf32> to vector<104x1xf32>
    %4 = vector.broadcast %3 : vector<104x1xf32> to vector<104x32xf32>
    %5 = arith.subf %0, %4 : vector<104x32xf32>
    %6 = math.exp %5 : vector<104x32xf32>
    %cst_3 = arith.constant dense<0.000000e+00> : vector<104xf32>
    %7 = vector.multi_reduction <add>, %6, %cst_3 [1] : vector<104x32xf32> to vector<104xf32>
    %8 = vector.shape_cast %7 : vector<104xf32> to vector<104x1xf32>
    %9 = math.log %8 : vector<104x1xf32>
    %10 = tpu.iota {dimensions = array<i32: 1>} : vector<1x32xi32>
    %11 = vector.broadcast %10 : vector<1x32xi32> to vector<104x32xi32>
    %12 = vector.broadcast %1 : vector<104x1xi32> to vector<104x32xi32>
    %13 = arith.cmpi eq, %11, %12 : vector<104x32xi32>
    %cst_4 = arith.constant 0.000000e+00 : f32
    %14 = vector.broadcast %cst_4 : f32 to vector<104x32xf32>
    %15 = arith.select %13, %5, %14 : vector<104x32xi1>, vector<104x32xf32>
    %cst_5 = arith.constant dense<0.000000e+00> : vector<104xf32>
    %16 = vector.multi_reduction <add>, %15, %cst_5 [1] : vector<104x32xf32> to vector<104xf32>
    %17 = vector.shape_cast %16 : vector<104xf32> to vector<104x1xf32>
    %18 = arith.subf %17, %9 : vector<104x1xf32>
    %cst_6 = arith.constant 0.000000e+00 : f32
    %19 = vector.broadcast %cst_6 : f32 to vector<104x1xf32>
    %20 = arith.minimumf %18, %19 : vector<104x1xf32>
    %21 = math.exp %20 : vector<104x1xf32>
    %cst_7 = arith.constant 1.000000e+00 : f32
    %22 = vector.broadcast %cst_7 : f32 to vector<104x1xf32>
    %23 = arith.subf %22, %21 : vector<104x1xf32>
    %24 = arith.mulf %23, %23 : vector<104x1xf32>
    %cst_8 = arith.constant -1.000000e+00 : f32
    %25 = vector.broadcast %cst_8 : f32 to vector<104x1xf32>
    %26 = arith.mulf %25, %24 : vector<104x1xf32>
    %27 = arith.mulf %26, %20 : vector<104x1xf32>
    %c0_9 = arith.constant 0 : index
    %c0_10 = arith.constant 0 : index
    %28 = vector.load %arg3[%c0_9, %c0_10] : memref<104x1xf32, #tpu.memory_space<vmem>>, vector<104x1xf32>
    tpu.vector_store %arg3[%c0_9, %c0_10], %27 {strides = array<i32>} : memref<104x1xf32, #tpu.memory_space<vmem>>, vector<104x1xf32>,
    return
  }
  func.func @transform_0(%arg0: i32) -> (i32, i32) {
    %c0_i32 = arith.constant 0 : i32
    %c0_i32_0 = arith.constant 0 : i32
    return %arg0, %c0_i32 : i32, i32
  }
  func.func @transform_1(%arg0: i32) -> (i32, i32) {
    %c0_i32 = arith.constant 0 : i32
    %c0_i32_0 = arith.constant 0 : i32
    return %arg0, %c0_i32 : i32, i32
  }
  func.func @transform_2(%arg0: i32) -> (i32, i32) {
    %c0_i32 = arith.constant 0 : i32
    %c0_i32_0 = arith.constant 0 : i32
    return %arg0, %c0_i32 : i32, i32
  }
}

</mosaic_0001>

<bundles_post_ra>
// kernel: tpu_custom_call.1
= control target key start
LH: loop header
LB: loop body
LE: loop exit
PB: predicated region body
PF: predicated region fallthrough
CT: control target
= control target key end

     0   :  { %vm37_vm0 = vcmask 261120   ;;  %v491_v9 = vmov 0   ;;  %vm391_vm14 = vcmask 7168   ;;  %s834_s0 = inlined_call_operand.vmem [shape: f32[104,32], index: 0, kind: input, shape index: {}]   ;;  %s835_s1 = inlined_call_operand.vmem [shape: s32[104,1], index: 1, kind: input, shape index: {}]   ;;  %s836_s2 = inlined_call_operand.vmem [shape: f32[104,1], index: 2, kind: output, shape index: {}]  }
   0x1   :  { %v510_v0 = vld [vmem:[%s834_s0 + $0x20] sm:$0xff]  ;;  %v515_v1 = vld [vmem:[%s834_s0 + $0x10] sm:$0xff]  ;;  %v531_v6 = vld [vmem:[%s834_s0 + $0x28] sm:$0xff]  ;;  %410 = vset.pattern.permute.xlu2 %v491_v9  ;;  %412 = vset.pattern.permute.xlu1 %v491_v9 }
   0x2   :  { %v520_v2 = vld [vmem:[%s834_s0] sm:$0xff]  ;;  %v50_v3 = vsel %vm37_vm0, %v510_v0, -inf  ;;  %v44_v4 = vsel %vm37_vm0, %v515_v1, -inf  ;;  %v536_v7 = vld [vmem:[%s834_s0 + $0x18] sm:$0xff]  ;;  %v541_v8 = vld [vmem:[%s834_s0 + $0x8] sm:$0xff]  ;;  %411 = vset.pattern.permute.xlu0 %v491_v9  ;;  %v53_v10 = vsel %vm37_vm0, %v531_v6, -inf }
   0x3   :  { %v38_v5 = vsel %vm37_vm0, %v520_v2, -inf  ;;  %51 = vmax.xlane.f32.xlu2 %v50_v3  ;;  %45 = vmax.xlane.f32.xlu1 %v44_v4  ;;  %v47_v11 = vsel %vm37_vm0, %v536_v7, -inf  ;;  %v41_v12 = vsel %vm37_vm0, %v541_v8, -inf  ;;  %v552_v13 = vld [vmem:[%s834_s0 + $0x40] sm:$0xff]  ;;  %v557_v14 = vld [vmem:[%s834_s0 + $0x38] sm:$0xff]  ;;  %v562_v15 = vld [vmem:[%s834_s0 + $0x30] sm:$0xff] }
   0x4   :  { %39 = vmax.xlane.f32.xlu0 %v38_v5  ;;  %v62_v16 = vsel %vm37_vm0, %v552_v13, -inf  ;;  %v59_v17 = vsel %vm37_vm0, %v557_v14, -inf  ;;  %v56_v18 = vsel %vm37_vm0, %v562_v15, -inf  ;;  %v573_v19 = vld [vmem:[%s834_s0 + $0x58] sm:$0xff]  ;;  %v578_v20 = vld [vmem:[%s834_s0 + $0x50] sm:$0xff]  ;;  %v583_v21 = vld [vmem:[%s834_s0 + $0x48] sm:$0xff] }
   0x5   :  { %v71_v22 = vsel %vm37_vm0, %v573_v19, -inf  ;;  %v68_v23 = vsel %vm37_vm0, %v578_v20, -inf  ;;  %v65_v24 = vsel %vm37_vm0, %v583_v21, -inf  ;;  %v594_v25 = vld [vmem:[%s834_s0 + $0x60] sm:$0xff]  ;;  %v26_v28 = vld [vmem:[%s835_s1 + $0x10] sm:$0xff]  ;;  %v25_v29 = vld [vmem:[%s835_s1 + $0x8] sm:$0xff] }
   0x6   :  { %v74_v26 = vsel %vm37_vm0, %v594_v25, -inf  ;;  %v24_v27 = vld [vmem:[%s835_s1] sm:$0xff]  ;;  %v27_v30 = vld [vmem:[%s835_s1 + $0x18] sm:$0xff]  ;;  %v29_v31 = vld [vmem:[%s835_s1 + $0x28] sm:$0xff] }
   0x7   :  { %v32_v32 = vld [vmem:[%s835_s1 + $0x40] sm:$0xff]  ;;  %v31_v34 = vld [vmem:[%s835_s1 + $0x38] sm:$0xff]  ;;  %v30_v36 = vld [vmem:[%s835_s1 + $0x30] sm:$0xff] }
   0x8   :  { %v28_v33 = vld [vmem:[%s835_s1 + $0x20] sm:$0xff]  ;;  %v35_v35 = vld [vmem:[%s835_s1 + $0x58] sm:$0xff]  ;;  %v34_v37 = vld [vmem:[%s835_s1 + $0x50] sm:$0xff] }
   0x9   :  { %v33_v38 = vld [vmem:[%s835_s1 + $0x48] sm:$0xff]  ;;  %v36_v39 = vld [vmem:[%s835_s1 + $0x60] sm:$0xff] }
   0xb   :  { %54 = vmax.xlane.f32.xlu2 %v53_v10  ;;  %48 = vmax.xlane.f32.xlu1 %v47_v11 }
   0xc   :  { %42 = vmax.xlane.f32.xlu0 %v41_v12 }
  0x13   :  { %63 = vmax.xlane.f32.xlu2 %v62_v16  ;;  %60 = vmax.xlane.f32.xlu1 %v59_v17 }
  0x14   :  { %57 = vmax.xlane.f32.xlu0 %v56_v18 }
  0x1b   :  { %72 = vmax.xlane.f32.xlu2 %v71_v22  ;;  %69 = vmax.xlane.f32.xlu1 %v68_v23 }
  0x1c   :  { %66 = vmax.xlane.f32.xlu0 %v65_v24 }
  0x24   :  { %75 = vmax.xlane.f32.xlu0 %v74_v26 }
  0x33   :  { %184 = vperm.xlu2 %410, %v24_v27  }
  0x34   :  { %190 = vperm.xlu1 %412, %v26_v28  }
  0x38   :  { %187 = vperm.xlu0 %411, %v25_v29  }
  0x3b   :  { %193 = vperm.xlu2 %410, %v27_v30  }
  0x3c   :  { %199 = vperm.xlu1 %412, %v29_v31  }
  0x40   :  { %208 = vperm.xlu0 %411, %v32_v32  }
  0x43   :  { %196 = vperm.xlu2 %410, %v28_v33  }
  0x44   :  { %205 = vperm.xlu1 %412, %v31_v34  }
  0x48   :  { %217 = vperm.xlu0 %411, %v35_v35  }
  0x4b   :  { %202 = vperm.xlu2 %410, %v30_v36  }
  0x4c   :  { %214 = vperm.xlu1 %412, %v34_v37  }
  0x53   :  { %211 = vperm.xlu2 %410, %v33_v38  }
  0x5b   :  { %220 = vperm.xlu2 %410, %v36_v39   ;;  %v181_v39 = vlaneseq }
  0x76   :  { %v52_v40 = vpop.xlane.xlu2 %51  ;;  %v46_v41 = vpop.xlane.xlu1 %45 }
  0x77   :  { %v638_v42 = vsub.f32 %v515_v1, %v46_v41  ;;  %v40_v43 = vpop.xlane.xlu0 %39  ;;  %v657_v56 = vsub.f32 %v510_v0, %v52_v40 }
  0x78   :  { %v641_v44 = vsub.f32 %v520_v2, %v40_v43  ;;  %v700_v43 = vand.u32 127, %v181_v39 }
  0x79   :  { %v94_v45 = vmul.f32 1.442695, %v638_v42  ;;  %v98_v61 = vmul.f32 1.442695, %v657_v56 }
  0x7a   :  { %v90_v46 = vmul.f32 1.442695, %v641_v44 }
  0x7b   :  { %413 = vpow2.f32 %v94_v45 }
  0x7c   :  { %415 = vpow2.f32 %v90_v46 }
  0x7e   :  { %v55_v47 = vpop.xlane.xlu2 %54  ;;  %v49_v48 = vpop.xlane.xlu1 %48 }
  0x7f   :  { %v646_v49 = vsub.f32 %v531_v6, %v55_v47  ;;  %v649_v50 = vsub.f32 %v536_v7, %v49_v48  ;;  %v43_v51 = vpop.xlane.xlu0 %42 }
  0x80   :  { %v652_v52 = vsub.f32 %v541_v8, %v43_v51 }
  0x81   :  { %v100_v53 = vmul.f32 1.442695, %v646_v49  ;;  %v96_v54 = vmul.f32 1.442695, %v649_v50  ;;  %v414_v55 = vpop.eup %413 }
  0x82   :  { %v92_v57 = vmul.f32 1.442695, %v652_v52  ;;  %v416_v58 = vpop.eup %415  ;;  %v122_v59 = vsel %vm37_vm0, %v414_v55, 0.0 }
  0x83   :  { %417 = vpow2.f32 %v100_v53  ;;  %123 = vadd.xlane.f32.xlu0 %v122_v59  ;;  %v116_v60 = vsel %vm37_vm0, %v416_v58, 0.0 }
  0x84   :  { %419 = vpow2.f32 %v96_v54  ;;  %117 = vadd.xlane.f32.xlu1 %v116_v60 }
  0x85   :  { %421 = vpow2.f32 %v92_v57 }
  0x86   :  { %v64_v62 = vpop.xlane.xlu2 %63  ;;  %v61_v63 = vpop.xlane.xlu1 %60  ;;  %423 = vpow2.f32 %v98_v61 }
  0x87   :  { %v664_v1 = vsub.f32 %v552_v13, %v64_v62  ;;  %v58_v0 = vpop.xlane.xlu0 %57  ;;  %v671_v5 = vsub.f32 %v557_v14, %v61_v63 }
  0x88   :  { %v667_v2 = vsub.f32 %v562_v15, %v58_v0 }
  0x89   :  { %v418_v3 = vpop.eup %417  ;;  %v106_v4 = vmul.f32 1.442695, %v664_v1  ;;  %v104_v12 = vmul.f32 1.442695, %v671_v5 }
  0x8a   :  { %v420_v6 = vpop.eup %419  ;;  %v102_v7 = vmul.f32 1.442695, %v667_v2  ;;  %v131_v8 = vsel %vm37_vm0, %v418_v3, 0.0 }
  0x8b   :  { %v422_v9 = vpop.eup %421  ;;  %425 = vpow2.f32 %v106_v4  ;;  %v125_v10 = vsel %vm37_vm0, %v420_v6, 0.0  ;;  %132 = vadd.xlane.f32.xlu0 %v131_v8 }
  0x8c   :  { %427 = vpow2.f32 %v102_v7  ;;  %v119_v11 = vsel %vm37_vm0, %v422_v9, 0.0  ;;  %126 = vadd.xlane.f32.xlu1 %v125_v10  ;;  %v424_v17 = vpop.eup %423 }
  0x8d   :  { %120 = vadd.xlane.f32.xlu2 %v119_v11  ;;  %429 = vpow2.f32 %v104_v12  ;;  %v128_v29 = vsel %vm37_vm0, %v424_v17, 0.0 }
  0x8e   :  { %v73_v13 = vpop.xlane.xlu2 %72  ;;  %v70_v14 = vpop.xlane.xlu1 %69 }
  0x8f   :  { %v679_v15 = vsub.f32 %v573_v19, %v73_v13  ;;  %v67_v16 = vpop.xlane.xlu0 %66  ;;  %v686_v24 = vsub.f32 %v578_v20, %v70_v14 }
  0x90   :  { %v682_v18 = vsub.f32 %v583_v21, %v67_v16 }
  0x91   :  { %v426_v22 = vpop.eup %425  ;;  %v112_v23 = vmul.f32 1.442695, %v679_v15  ;;  %v110_v21 = vmul.f32 1.442695, %v686_v24 }
  0x92   :  { %v428_v26 = vpop.eup %427  ;;  %v108_v27 = vmul.f32 1.442695, %v682_v18  ;;  %v140_v28 = vsel %vm37_vm0, %v426_v22, 0.0 }
  0x93   :  { %431 = vpow2.f32 %v112_v23  ;;  %v134_v19 = vsel %vm37_vm0, %v428_v26, 0.0  ;;  %141 = vadd.xlane.f32.xlu0 %v140_v28  ;;  %v430_v31 = vpop.eup %429 }
  0x94   :  { %433 = vpow2.f32 %v108_v27  ;;  %135 = vadd.xlane.f32.xlu1 %v134_v19  ;;  %v137_v36 = vsel %vm37_vm0, %v430_v31, 0.0 }
  0x95   :  { %129 = vadd.xlane.f32.xlu2 %v128_v29  ;;  %435 = vpow2.f32 %v110_v21 }
  0x96   :  { %v185_v30 = vpop.permute.xlu2 %184 }
  0x97   :  { %v76_v20 = vpop.xlane.xlu0 %75  ;;  %vm222_vm1 = vcmp.eq.s32.totalorder %v700_v43, %v185_v30 }
  0x98   :  { %v694_v32 = vsub.f32 %v594_v25, %v76_v20  ;;  %v235_v53 = vsel %vm222_vm1, %v641_v44, 0.0 }
  0x99   :  { %v432_v33 = vpop.eup %431  ;;  %v248_v57 = vsel %vm37_vm0, %v235_v53, 0.0 }
  0x9a   :  { %v434_v34 = vpop.eup %433  ;;  %v114_v35 = vmul.f32 1.442695, %v694_v32  ;;  %v149_v37 = vsel %vm37_vm0, %v432_v33, 0.0 }
  0x9b   :  { %v143_v38 = vsel %vm37_vm0, %v434_v34, 0.0  ;;  %150 = vadd.xlane.f32.xlu0 %v149_v37  ;;  %v436_v41 = vpop.eup %435 }
  0x9c   :  { %437 = vpow2.f32 %v114_v35  ;;  %144 = vadd.xlane.f32.xlu1 %v143_v38  ;;  %v146_v45 = vsel %vm37_vm0, %v436_v41, 0.0 }
  0x9d   :  { %138 = vadd.xlane.f32.xlu2 %v137_v36 }
  0x9e   :  { %v194_v40 = vpop.permute.xlu2 %193 }
  0x9f   :  { %vm225_vm4 = vcmp.eq.s32.totalorder %v700_v43, %v194_v40 }
  0xa0   :  { %v238_v61 = vsel %vm225_vm4, %v649_v50, 0.0 }
  0xa1   :  { %v257_v0 = vsel %vm37_vm0, %v238_v61, 0.0 }
  0xa2   :  { %v438_v25 = vpop.eup %437 }
  0xa3   :  { %v152_v46 = vsel %vm37_vm0, %v438_v25, 0.0 }
  0xa4   :  { %153 = vadd.xlane.f32.xlu1 %v152_v46 }
  0xa5   :  { %147 = vadd.xlane.f32.xlu2 %v146_v45 }
  0xa6   :  { %v197_v47 = vpop.permute.xlu2 %196  ;;  %v191_v48 = vpop.permute.xlu1 %190 }
  0xa7   :  { %vm224_vm2 = vcmp.eq.s32.totalorder %v700_v43, %v191_v48  ;;  %vm226_vm5 = vcmp.eq.s32.totalorder %v700_v43, %v197_v47 }
  0xa8   :  { %v237_v51 = vsel %vm224_vm2, %v638_v42, 0.0  ;;  %v239_v60 = vsel %vm226_vm5, %v657_v56, 0.0 }
  0xa9   :  { %v254_v55 = vsel %vm37_vm0, %v237_v51, 0.0  ;;  %v260_v63 = vsel %vm37_vm0, %v239_v60, 0.0 }
  0xaa   :  { %v188_v54 = vpop.permute.xlu0 %187 }
  0xab   :  { %vm223_vm3 = vcmp.eq.s32.totalorder %v700_v43, %v188_v54 }
  0xac   :  { %v236_v58 = vsel %vm223_vm3, %v652_v52, 0.0  ;;  %249 = vadd.xlane.f32.xlu1 %v248_v57 }
  0xad   :  { %255 = vadd.xlane.f32.xlu2 %v254_v55  ;;  %v251_v59 = vsel %vm37_vm0, %v236_v58, 0.0 }
  0xae   :  { %252 = vadd.xlane.f32.xlu0 %v251_v59  ;;  %v200_v42 = vpop.permute.xlu1 %199  ;;  %v203_v44 = vpop.permute.xlu2 %202 }
  0xaf   :  { %vm227_vm6 = vcmp.eq.s32.totalorder %v700_v43, %v200_v42  ;;  %vm228_vm7 = vcmp.eq.s32.totalorder %v700_v43, %v203_v44 }
  0xb0   :  { %v240_v52 = vsel %vm227_vm6, %v646_v49, 0.0  ;;  %v241_v49 = vsel %vm228_vm7, %v667_v2, 0.0 }
  0xb1   :  { %v263_v3 = vsel %vm37_vm0, %v240_v52, 0.0  ;;  %v266_v9 = vsel %vm37_vm0, %v241_v49, 0.0 }
  0xb2   :  { %v209_v62 = vpop.permute.xlu0 %208 }
  0xb3   :  { %vm230_vm8 = vcmp.eq.s32.totalorder %v700_v43, %v209_v62 }
  0xb4   :  { %258 = vadd.xlane.f32.xlu1 %v257_v0  ;;  %v243_v7 = vsel %vm230_vm8, %v664_v1, 0.0 }
  0xb5   :  { %261 = vadd.xlane.f32.xlu2 %v260_v63  ;;  %v272_v10 = vsel %vm37_vm0, %v243_v7, 0.0 }
  0xb6   :  { %264 = vadd.xlane.f32.xlu0 %v263_v3  ;;  %v206_v4 = vpop.permute.xlu1 %205  ;;  %v212_v56 = vpop.permute.xlu2 %211 }
  0xb7   :  { %vm229_vm9 = vcmp.eq.s32.totalorder %v700_v43, %v206_v4  ;;  %vm231_vm10 = vcmp.eq.s32.totalorder %v700_v43, %v212_v56 }
  0xb8   :  { %v242_v50 = vsel %vm229_vm9, %v671_v5, 0.0  ;;  %v244_v5 = vsel %vm231_vm10, %v682_v18, 0.0 }
  0xb9   :  { %v269_v6 = vsel %vm37_vm0, %v242_v50, 0.0  ;;  %v275_v14 = vsel %vm37_vm0, %v244_v5, 0.0 }
  0xba   :  { %v218_v8 = vpop.permute.xlu0 %217 }
  0xbb   :  { %vm233_vm11 = vcmp.eq.s32.totalorder %v700_v43, %v218_v8 }
  0xbc   :  { %267 = vadd.xlane.f32.xlu1 %v266_v9  ;;  %v246_v12 = vsel %vm233_vm11, %v679_v15, 0.0 }
  0xbd   :  { %270 = vadd.xlane.f32.xlu2 %v269_v6  ;;  %v281_v16 = vsel %vm37_vm0, %v246_v12, 0.0 }
  0xbe   :  { %273 = vadd.xlane.f32.xlu0 %v272_v10  ;;  %v215_v11 = vpop.permute.xlu1 %214  ;;  %v221_v13 = vpop.permute.xlu2 %220 }
  0xbf   :  { %vm232_vm12 = vcmp.eq.s32.totalorder %v700_v43, %v215_v11  ;;  %vm234_vm13 = vcmp.eq.s32.totalorder %v700_v43, %v221_v13 }
  0xc0   :  { %v245_v2 = vsel %vm232_vm12, %v686_v24, 0.0  ;;  %v247_v17 = vsel %vm234_vm13, %v694_v32, 0.0 }
  0xc1   :  { %v278_v1 = vsel %vm37_vm0, %v245_v2, 0.0  ;;  %v284_v22 = vsel %vm37_vm0, %v247_v17, 0.0 }
  0xc4   :  { %276 = vadd.xlane.f32.xlu1 %v275_v14 }
  0xc5   :  { %279 = vadd.xlane.f32.xlu2 %v278_v1 }
  0xc6   :  { %282 = vadd.xlane.f32.xlu0 %v281_v16 }
  0xcc   :  { %285 = vadd.xlane.f32.xlu1 %v284_v22 }
  0xf6   :  { %v124_v23 = vpop.xlane.xlu0 %123 }
  0xf7   :  { %v118_v18 = vpop.xlane.xlu1 %117  ;;  %439 = vlog2.f32 %v124_v23 }
  0xf8   :  { %441 = vlog2.f32 %v118_v18 }
  0xfd   :  { %v440_v32 = vpop.eup %439 }
  0xfe   :  { %v133_v15 = vpop.xlane.xlu0 %132  ;;  %v442_v33 = vpop.eup %441  ;;  %v160_v36 = vmul.f32 0.6931472, %v440_v32 }
  0xff   :  { %v127_v24 = vpop.xlane.xlu1 %126  ;;  %v156_v35 = vmul.f32 0.6931472, %v442_v33 }
 0x100   :  { %v121_v26 = vpop.xlane.xlu2 %120 }
 0x101   :  { %443 = vlog2.f32 %v121_v26 }
 0x102   :  { %445 = vlog2.f32 %v127_v24 }
 0x106   :  { %v142_v19 = vpop.xlane.xlu0 %141 }
 0x107   :  { %v136_v28 = vpop.xlane.xlu1 %135  ;;  %v444_v34 = vpop.eup %443 }
 0x108   :  { %v130_v27 = vpop.xlane.xlu2 %129  ;;  %v158_v37 = vmul.f32 0.6931472, %v444_v34  ;;  %v446_v45 = vpop.eup %445 }
 0x109   :  { %447 = vlog2.f32 %v130_v27  ;;  %v162_v58 = vmul.f32 0.6931472, %v446_v45 }
 0x10a   :  { %449 = vlog2.f32 %v133_v15 }
 0x10b   :  { %451 = vlog2.f32 %v142_v19 }
 0x10c   :  { %453 = vlog2.f32 %v136_v28 }
 0x10e   :  { %v151_v30 = vpop.xlane.xlu0 %150 }
 0x10f   :  { %v145_v21 = vpop.xlane.xlu1 %144  ;;  %v448_v48 = vpop.eup %447 }
 0x110   :  { %v139_v29 = vpop.xlane.xlu2 %138  ;;  %v450_v53 = vpop.eup %449  ;;  %v164_v59 = vmul.f32 0.6931472, %v448_v48 }
 0x111   :  { %455 = vlog2.f32 %v139_v29  ;;  %v166_v42 = vmul.f32 0.6931472, %v450_v53  ;;  %v452_v63 = vpop.eup %451 }
 0x112   :  { %v454_v3 = vpop.eup %453  ;;  %v172_v13 = vmul.f32 0.6931472, %v452_v63 }
 0x113   :  { %v168_v5 = vmul.f32 0.6931472, %v454_v3 }
 0x117   :  { %v743_v20 = vpop.xlane.xlu1 %153  ;;  %v456_v56 = vpop.eup %455 }
 0x118   :  { %v148_v31 = vpop.xlane.xlu2 %147  ;;  %v170_v1 = vmul.f32 0.6931472, %v456_v56 }
 0x11f   :  { %v250_v39 = vpop.xlane.xlu1 %249 }
 0x120   :  { %v256_v38 = vpop.xlane.xlu2 %255  ;;  %v287_v41 = vsub.f32 %v250_v39, %v156_v35 }
 0x121   :  { %v289_v40 = vsub.f32 %v256_v38, %v160_v36  ;;  %v253_v25 = vpop.xlane.xlu0 %252 }
 0x122   :  { %v288_v43 = vsub.f32 %v253_v25, %v158_v37  ;;  %v747_v47 = vmin.f32 %v287_v41, 0.0 }
 0x123   :  { %v745_v46 = vmin.f32 %v289_v40, 0.0 }
 0x124   :  { %v749_v51 = vmin.f32 %v288_v43, 0.0  ;;  %v313_v55 = vmul.f32 1.442695, %v747_v47 }
 0x125   :  { %v317_v54 = vmul.f32 1.442695, %v745_v46 }
 0x126   :  { %v315_v57 = vmul.f32 1.442695, %v749_v51 }
 0x127   :  { %457 = vpow2.f32 %v317_v54  ;;  %v259_v60 = vpop.xlane.xlu1 %258 }
 0x128   :  { %459 = vpow2.f32 %v313_v55  ;;  %v262_v44 = vpop.xlane.xlu2 %261  ;;  %v290_v62 = vsub.f32 %v259_v60, %v162_v58 }
 0x129   :  { %461 = vpow2.f32 %v315_v57  ;;  %v291_v61 = vsub.f32 %v262_v44, %v164_v59  ;;  %v265_v52 = vpop.xlane.xlu0 %264 }
 0x12a   :  { %v292_v0 = vsub.f32 %v265_v52, %v166_v42  ;;  %v756_v50 = vmin.f32 %v290_v62, 0.0  ;;  %463 = vlog2.f32 %v151_v30 }
 0x12b   :  { %v754_v4 = vmin.f32 %v291_v61, 0.0  ;;  %465 = vlog2.f32 %v145_v21 }
 0x12c   :  { %v758_v49 = vmin.f32 %v292_v0, 0.0  ;;  %v319_v8 = vmul.f32 1.442695, %v756_v50  ;;  %467 = vlog2.f32 %v148_v31 }
 0x12d   :  { %v458_v6 = vpop.eup %457  ;;  %v321_v7 = vmul.f32 1.442695, %v754_v4 }
 0x12e   :  { %v460_v9 = vpop.eup %459  ;;  %v341_v10 = vsub.f32 1.0, %v458_v6  ;;  %v323_v11 = vmul.f32 1.442695, %v758_v49 }
 0x12f   :  { %v462_v2 = vpop.eup %461  ;;  %v339_v12 = vsub.f32 1.0, %v460_v9  ;;  %469 = vpow2.f32 %v321_v7  ;;  %v268_v22 = vpop.xlane.xlu1 %267 }
 0x130   :  { %v354_v14 = vmul.f32 %v341_v10, %v341_v10  ;;  %v340_v16 = vsub.f32 1.0, %v462_v2  ;;  %471 = vpow2.f32 %v319_v8  ;;  %v271_v17 = vpop.xlane.xlu2 %270  ;;  %v293_v24 = vsub.f32 %v268_v22, %v168_v5  ;;  %v464_v15 = vpop.eup %463 }
 0x131   :  { %v352_v18 = vmul.f32 %v339_v12, %v339_v12  ;;  %473 = vpow2.f32 %v323_v11  ;;  %v294_v23 = vsub.f32 %v271_v17, %v170_v1  ;;  %v274_v26 = vpop.xlane.xlu0 %273  ;;  %v466_v29 = vpop.eup %465 }
 0x132   :  { %v367_v27 = vmul.f32 -1.0, %v354_v14  ;;  %v353_v28 = vmul.f32 %v340_v16, %v340_v16  ;;  %v295_v19 = vsub.f32 %v274_v26, %v172_v13  ;;  %v765_v31 = vmin.f32 %v293_v24, 0.0  ;;  %v468_v32 = vpop.eup %467 }
 0x133   :  { %v365_v21 = vmul.f32 -1.0, %v352_v18  ;;  %v763_v30 = vmin.f32 %v294_v23, 0.0  ;;  %475 = vlog2.f32 %v743_v20  ;;  %v178_v20 = vmul.f32 0.6931472, %v464_v15 }
 0x134   :  { %v380_v33 = vmul.f32 %v367_v27, %v745_v46  ;;  %v366_v34 = vmul.f32 -1.0, %v353_v28  ;;  %v768_v35 = vmin.f32 %v295_v19, 0.0  ;;  %v325_v39 = vmul.f32 1.442695, %v765_v31 }
 0x135   :  { %v470_v36 = vpop.eup %469  ;;  %v378_v37 = vmul.f32 %v365_v21, %v747_v47  ;;  %v327_v38 = vmul.f32 1.442695, %v763_v30  ;;  %v174_v46 = vmul.f32 0.6931472, %v466_v29  ;;  %v176_v47 = vmul.f32 0.6931472, %v468_v32 }
 0x136   :  { %v472_v40 = vpop.eup %471  ;;  %394 = vst.msk [vmem:[%s836_s2 + $0x10] sm:$0xff] %vm391_vm14, %v380_v33  ;;  %v379_v41 = vmul.f32 %v366_v34, %v749_v51  ;;  %v343_v25 = vsub.f32 1.0, %v470_v36  ;;  %v329_v43 = vmul.f32 1.442695, %v768_v35 }
 0x137   :  { %v474_v45 = vpop.eup %473  ;;  %392 = vst.msk [vmem:[%s836_s2] sm:$0xff] %vm391_vm14, %v378_v37  ;;  %v342_v48 = vsub.f32 1.0, %v472_v40  ;;  %477 = vpow2.f32 %v327_v38  ;;  %v277_v55 = vpop.xlane.xlu1 %276 }
 0x138   :  { %393 = vst.msk [vmem:[%s836_s2 + $0x8] sm:$0xff] %vm391_vm14, %v379_v41  ;;  %v356_v51 = vmul.f32 %v343_v25, %v343_v25  ;;  %v344_v53 = vsub.f32 1.0, %v474_v45  ;;  %479 = vpow2.f32 %v325_v39  ;;  %v280_v54 = vpop.xlane.xlu2 %279  ;;  %v296_v59 = vsub.f32 %v277_v55, %v174_v46 }
 0x139   :  { %v355_v57 = vmul.f32 %v342_v48, %v342_v48  ;;  %481 = vpow2.f32 %v329_v43  ;;  %v297_v58 = vsub.f32 %v280_v54, %v176_v47  ;;  %v283_v42 = vpop.xlane.xlu0 %282  ;;  %v476_v0 = vpop.eup %475 }
 0x13a   :  { %v369_v44 = vmul.f32 -1.0, %v356_v51  ;;  %v357_v60 = vmul.f32 %v344_v53, %v344_v53  ;;  %v298_v61 = vsub.f32 %v283_v42, %v178_v20  ;;  %v309_v63 = vmin.f32 %v296_v59, 0.0 }
 0x13b   :  { %v368_v62 = vmul.f32 -1.0, %v355_v57  ;;  %v310_v52 = vmin.f32 %v297_v58, 0.0  ;;  %v180_v13 = vmul.f32 0.6931472, %v476_v0 }
 0x13c   :  { %v382_v3 = vmul.f32 %v369_v44, %v754_v4  ;;  %v370_v56 = vmul.f32 -1.0, %v357_v60  ;;  %v311_v6 = vmin.f32 %v298_v61, 0.0  ;;  %v331_v10 = vmul.f32 1.442695, %v309_v63 }
 0x13d   :  { %v478_v7 = vpop.eup %477  ;;  %v381_v8 = vmul.f32 %v368_v62, %v756_v50  ;;  %v333_v9 = vmul.f32 1.442695, %v310_v52 }
 0x13e   :  { %v480_v11 = vpop.eup %479  ;;  %396 = vst.msk [vmem:[%s836_s2 + $0x20] sm:$0xff] %vm391_vm14, %v382_v3  ;;  %v383_v2 = vmul.f32 %v370_v56, %v758_v49  ;;  %v346_v5 = vsub.f32 1.0, %v478_v7  ;;  %v335_v1 = vmul.f32 1.442695, %v311_v6 }
 0x13f   :  { %v482_v12 = vpop.eup %481  ;;  %395 = vst.msk [vmem:[%s836_s2 + $0x18] sm:$0xff] %vm391_vm14, %v381_v8  ;;  %v345_v4 = vsub.f32 1.0, %v480_v11  ;;  %483 = vpow2.f32 %v333_v9  ;;  %v286_v49 = vpop.xlane.xlu1 %285 }
 0x140   :  { %397 = vst.msk [vmem:[%s836_s2 + $0x28] sm:$0xff] %vm391_vm14, %v383_v2  ;;  %v359_v50 = vmul.f32 %v346_v5, %v346_v5  ;;  %v347_v14 = vsub.f32 1.0, %v482_v12  ;;  %485 = vpow2.f32 %v331_v10  ;;  %v299_v17 = vsub.f32 %v286_v49, %v180_v13 }
 0x141   :  { %v358_v16 = vmul.f32 %v345_v4, %v345_v4  ;;  %487 = vpow2.f32 %v335_v1 }
 0x142   :  { %v372_v22 = vmul.f32 -1.0, %v359_v50  ;;  %v360_v18 = vmul.f32 %v347_v14, %v347_v14  ;;  %v312_v24 = vmin.f32 %v299_v17, 0.0 }
 0x143   :  { %v371_v23 = vmul.f32 -1.0, %v358_v16 }
 0x144   :  { %v385_v26 = vmul.f32 %v372_v22, %v763_v30  ;;  %v373_v15 = vmul.f32 -1.0, %v360_v18  ;;  %v337_v19 = vmul.f32 1.442695, %v312_v24 }
 0x145   :  { %v484_v27 = vpop.eup %483  ;;  %v384_v28 = vmul.f32 %v371_v23, %v765_v31 }
 0x146   :  { %v486_v29 = vpop.eup %485  ;;  %399 = vst.msk [vmem:[%s836_s2 + $0x38] sm:$0xff] %vm391_vm14, %v385_v26  ;;  %v386_v21 = vmul.f32 %v373_v15, %v768_v35  ;;  %v349_v32 = vsub.f32 1.0, %v484_v27  ;;  %489 = vpow2.f32 %v337_v19 }
 0x147   :  { %v488_v33 = vpop.eup %487  ;;  %398 = vst.msk [vmem:[%s836_s2 + $0x30] sm:$0xff] %vm391_vm14, %v384_v28  ;;  %v348_v30 = vsub.f32 1.0, %v486_v29 }
 0x148   :  { %400 = vst.msk [vmem:[%s836_s2 + $0x40] sm:$0xff] %vm391_vm14, %v386_v21  ;;  %v362_v31 = vmul.f32 %v349_v32, %v349_v32  ;;  %v350_v34 = vsub.f32 1.0, %v488_v33 }
 0x149   :  { %v361_v36 = vmul.f32 %v348_v30, %v348_v30 }
 0x14a   :  { %v375_v37 = vmul.f32 -1.0, %v362_v31  ;;  %v363_v38 = vmul.f32 %v350_v34, %v350_v34 }
 0x14b   :  { %v374_v35 = vmul.f32 -1.0, %v361_v36 }
 0x14c   :  { %v388_v39 = vmul.f32 %v375_v37, %v310_v52  ;;  %v376_v40 = vmul.f32 -1.0, %v363_v38  ;;  %v490_v41 = vpop.eup %489 }
 0x14d   :  { %v387_v25 = vmul.f32 %v374_v35, %v309_v63  ;;  %v351_v45 = vsub.f32 1.0, %v490_v41 }
 0x14e   :  { %402 = vst.msk [vmem:[%s836_s2 + $0x50] sm:$0xff] %vm391_vm14, %v388_v39  ;;  %v389_v43 = vmul.f32 %v376_v40, %v311_v6 }
 0x14f   :  { %401 = vst.msk [vmem:[%s836_s2 + $0x48] sm:$0xff] %vm391_vm14, %v387_v25  ;;  %v364_v46 = vmul.f32 %v351_v45, %v351_v45 }
 0x150   :  { %403 = vst.msk [vmem:[%s836_s2 + $0x58] sm:$0xff] %vm391_vm14, %v389_v43 }
 0x151   :  { %v377_v47 = vmul.f32 -1.0, %v364_v46 }
 0x153   :  { %v390_v48 = vmul.f32 %v377_v47, %v312_v24 }
 0x155   :  { %404 = vst.msk [vmem:[%s836_s2 + $0x60] sm:$0xff] %vm391_vm14, %v390_v48 }

</bundles_post_ra>
